<compile_context>
chip_gen: v7x
topology: tpu7x:2x2x1
jax: 0.10.0
libtpu: 0.0.40
codegen_flags: <defaults>
</compile_context>

<pallas_src>
import jax
import jax.numpy as jnp
from jax.experimental import pallas as pl
from jax.experimental.pallas import tpu as pltpu


def _vae_forward_kernel(x_ref, w1_ref, wmid_ref, bmid_ref, wh_ref, bh_ref, out_ref):
    # x: (TB, ctx_pad) with a constant 1.0 bias lane at index `ctx`; b1 is folded
    # into row `ctx` of w1, so the first layer needs no separate bias add.
    x = x_ref[...]
    h = jnp.tanh(jnp.dot(x, w1_ref[...],
                         preferred_element_type=jnp.float32))            # (TB, L) f32

    # Fused middle layers (Wmid = W2@Wf, bmid = b2@Wf + bf) + feature_extractor tanh.
    # NOTE: activations occupy only 32 of 128 lanes per vreg; if profiling shows the
    # EUP binding on v6e/v7x at large tiles, switch to the transposed (lane-dense)
    # formulation (h^T = W1^T @ x^T).
    y = jnp.tanh(jnp.dot(h.astype(wmid_ref.dtype), wmid_ref[...],
                         preferred_element_type=jnp.float32) + bmid_ref[...])  # (TB, F)

    # Fused head: cols 0:F = fc_mu(y), col F = value_pred(fc_mu(y)), rest zero.
    out_ref[...] = (jnp.dot(y.astype(wh_ref.dtype), wh_ref[...],
                            preferred_element_type=jnp.float32)
                    + bh_ref[...]).astype(out_ref.dtype)


def pack_params(params, *, compute_dtype=jnp.bfloat16):
    """One-time parameter preprocessing.

    - pad W1 rows to a 128 multiple and fold b1 into row `ctx` (bias lane trick),
    - fuse the two middle linears (no nonlinearity between them): Wmid = W2@Wf,
      bmid = b2@Wf + bf,
    - fold value_pred into fc_mu as a 128-lane packed head [mu | value | 0].
    Weights are stored in `compute_dtype` (bf16 by default); biases stay f32 since
    they are added after the f32 matmul accumulation.
    """
    ctx, latent = params["w1"].shape
    feat = params["wmu"].shape[1]
    ctx_pad = 128 * pl.cdiv(ctx + 1, 128)          # +1 for the bias lane
    head_pad = 128 * pl.cdiv(feat + 1, 128)

    w1p = jnp.zeros((ctx_pad, latent), jnp.float32)
    w1p = w1p.at[:ctx, :].set(params["w1"]).at[ctx:ctx + 1, :].set(params["b1"])

    wmid = params["w2"] @ params["wf"]                       # (L, F)
    bmid = params["b2"] @ params["wf"] + params["bf"]        # (1, F)

    wv_eff = params["wmu"] @ params["wv"]                    # (F, 1)
    bv_eff = params["bmu"] @ params["wv"]                    # (1, 1)
    wh = jnp.zeros((feat, head_pad), jnp.float32)
    wh = wh.at[:, :feat].set(params["wmu"]).at[:, feat:feat + 1].set(wv_eff)
    bh = jnp.zeros((1, head_pad), jnp.float32)
    bh = bh.at[:, :feat].set(params["bmu"]).at[:, feat:feat + 1].set(bv_eff)

    return {
        "w1": w1p.astype(compute_dtype),
        "wmid": wmid.astype(compute_dtype),
        "bmid": bmid.astype(jnp.float32),
        "wh": wh.astype(compute_dtype),
        "bh": bh.astype(jnp.float32),
        "meta": {"ctx": ctx, "ctx_pad": ctx_pad, "latent": latent,
                 "feat": feat, "head_pad": head_pad},
    }


def concat_policy_features(policy, *, ctx_pad, b_pad, dtype):
    """ConcatWeights.forward fused with the kernel's lane / bias-lane / batch padding.

    Emits the (b_pad, ctx_pad) slab via one concatenate (plus one batch pad when
    needed), directly in the kernel's compute dtype, so x hits HBM exactly once.
    """
    weights, biases = policy
    batch = weights[0].shape[0]
    parts = [w.reshape(batch, -1).astype(dtype) for w in weights]
    parts += [b.reshape(batch, -1).astype(dtype) for b in biases]
    ctx = sum(int(p.shape[1]) for p in parts)
    parts.append(jnp.ones((batch, 1), dtype))                        # bias lane (folds b1)
    if ctx_pad > ctx + 1:
        parts.append(jnp.zeros((batch, ctx_pad - ctx - 1), dtype))   # zero lane padding
    x = jnp.concatenate(parts, axis=-1)
    if b_pad > batch:
        x = jnp.pad(x, ((0, b_pad - batch), (0, 0)))
    return x, ctx


def neural_bandit_vae_forward_packed(policy, packed, *, batch_tile=4096):
    """Runs the fused forward pass; returns the packed (b_pad, head_pad) f32 slab
    (mu in cols 0:feat, mean_value in col feat), plus (batch, feat)."""
    meta = packed["meta"]
    ctx_pad, latent = packed["w1"].shape
    feat, head_pad = packed["wh"].shape
    dtype = packed["w1"].dtype

    batch = policy[0][0].shape[0]
    b8 = max(8, 8 * pl.cdiv(batch, 8))
    batch_tile = max(8, (batch_tile // 8) * 8)
    n_tiles = pl.cdiv(b8, batch_tile)
    if b8 >= 16:
        n_tiles = max(n_tiles, 2)     # keep >=2 tiles so v7x's 2 TCs both get work
    tb = 8 * pl.cdiv(pl.cdiv(b8, n_tiles), 8)
    b_pad = n_tiles * tb

    x, ctx = concat_policy_features(policy, ctx_pad=ctx_pad, b_pad=b_pad, dtype=dtype)
    assert ctx == meta["ctx"], (ctx, meta["ctx"])

    x_spec_kwargs = {}
    if n_tiles >= 3:
        # Triple-buffer the x stream; per-tile DMA is short on v7x's fast HBM.
        x_spec_kwargs["pipeline_mode"] = pl.Buffered(3)

    param_bytes = sum(int(v.size) * v.dtype.itemsize
                      for k, v in packed.items() if k != "meta")
    cost = pl.CostEstimate(
        flops=2 * b_pad * (ctx_pad * latent + latent * feat + feat * head_pad),
        transcendentals=b_pad * (latent + feat),
        bytes_accessed=(x.dtype.itemsize * b_pad * ctx_pad
                        + 4 * b_pad * head_pad + param_bytes),
    )

    const2 = lambda i: (0, 0)   # parameters stay VMEM-resident across grid steps
    out = pl.pallas_call(
        _vae_forward_kernel,
        out_shape=jax.ShapeDtypeStruct((b_pad, head_pad), jnp.float32),
        grid=(n_tiles,),
        in_specs=[
            pl.BlockSpec((tb, ctx_pad), lambda i: (i, 0), **x_spec_kwargs),  # x (pipelined)
            pl.BlockSpec((ctx_pad, latent), const2),                         # W1 (+b1 row)
            pl.BlockSpec((latent, feat), const2),                            # W2@Wf
            pl.BlockSpec((1, feat), const2),                                 # b2@Wf + bf
            pl.BlockSpec((feat, head_pad), const2),                          # packed head W
            pl.BlockSpec((1, head_pad), const2),                             # packed head b
        ],
        out_specs=pl.BlockSpec((tb, head_pad), lambda i: (i, 0)),
        compiler_params=pltpu.CompilerParams(dimension_semantics=("parallel",)),
        cost_estimate=cost,
    )(x, packed["w1"], packed["wmid"], packed["bmid"], packed["wh"], packed["bh"])

    return out, batch, feat


def neural_bandit_vae_forward(policy, packed, *, batch_tile=4096):
    """Equivalent of NeuralBanditModelVAEGaussian.forward (no_embedding=False).

    NOTE: downstream jit code should prefer `neural_bandit_vae_forward_packed` and
    slice the slab at its point of use so the slices fuse into the consumer instead
    of re-materializing mu / mean_value in HBM.
    """
    out, batch, feat = neural_bandit_vae_forward_packed(policy, packed,
                                                        batch_tile=batch_tile)
    mean_value = out[:batch, feat:feat + 1]
    mu = out[:batch, :feat]
    return mean_value, mu


def make_params(key, context_dim, latent_dim, feat_dim):
    """Deterministic synthetic parameters (weights stored as [in, out] = W.T)."""
    ks = jax.random.split(key, 9)
    s = 0.1
    return {
        "w1": s * jax.random.normal(ks[0], (context_dim, latent_dim), jnp.float32),
        "b1": s * jax.random.normal(ks[1], (1, latent_dim), jnp.float32),
        "w2": s * jax.random.normal(ks[2], (latent_dim, latent_dim), jnp.float32),
        "b2": s * jax.random.normal(ks[3], (1, latent_dim), jnp.float32),
        "wf": s * jax.random.normal(ks[4], (latent_dim, feat_dim), jnp.float32),
        "bf": s * jax.random.normal(ks[5], (1, feat_dim), jnp.float32),
        "wmu": s * jax.random.normal(ks[6], (feat_dim, feat_dim), jnp.float32),
        "bmu": s * jax.random.normal(ks[7], (1, feat_dim), jnp.float32),
        "wv": s * jax.random.normal(ks[8], (feat_dim, 1), jnp.float32),
    }


if __name__ == "__main__":
    key = jax.random.PRNGKey(0)
    weight_shapes = [(4, 8), (8, 3)]
    bias_shapes = [(8,), (3,)]
    layers_size = [32, 32]
    latent_dim = layers_size[0]            # state_based_value = False
    feat_dim = layers_size[-1]
    context_dim = sum(a * b for a, b in weight_shapes) + sum(s[0] for s in bias_shapes)  # 67

    kp, kw1, kw2, kb1, kb2 = jax.random.split(key, 5)
    params = make_params(kp, context_dim, latent_dim, feat_dim)

    def make_policy(batch, keys):
        w = [jax.random.normal(keys[0], (batch,) + weight_shapes[0], jnp.float32),
             jax.random.normal(keys[1], (batch,) + weight_shapes[1], jnp.float32)]
        b = [jax.random.normal(keys[2], (batch,) + bias_shapes[0], jnp.float32),
             jax.random.normal(keys[3], (batch,) + bias_shapes[1], jnp.float32)]
        return (w, b)

    def reference(policy):
        """Plain-JAX f32 reference with the original (unfused) layer order."""
        weights, biases = policy
        batch = weights[0].shape[0]
        x = jnp.concatenate([w.reshape(batch, -1) for w in weights]
                            + [b.reshape(batch, -1) for b in biases], axis=-1)
        h = jnp.tanh(x @ params["w1"] + params["b1"])
        z = h @ params["w2"] + params["b2"]
        y = jnp.tanh(z @ params["wf"] + params["bf"])
        mu = y @ params["wmu"] + params["bmu"]
        val = mu @ params["wv"]
        return val, mu

    # --- small batch, f32 packing: exact check of the offline fusions ------------
    policy = make_policy(2, [kw1, kw2, kb1, kb2])
    val_ref, mu_ref = reference(policy)

    packed_f32 = pack_params(params, compute_dtype=jnp.float32)
    mean_value, mu = neural_bandit_vae_forward(policy, packed_f32)
    jax.block_until_ready((mean_value, mu))
    assert mu.shape == (2, feat_dim) and mean_value.shape == (2, 1)
    assert jnp.allclose(mu, mu_ref, atol=1e-5, rtol=1e-5), "mu mismatch (f32)"
    assert jnp.allclose(mean_value, val_ref, atol=1e-5, rtol=1e-5), "value mismatch (f32)"

    # --- small batch, bf16 packing (default fast path; f32 accumulation) ---------
    packed_bf16 = pack_params(params)
    mean_value, mu = neural_bandit_vae_forward(policy, packed_bf16)
    jax.block_until_ready((mean_value, mu))
    assert jnp.allclose(mu, mu_ref, atol=2e-2, rtol=2e-2), "mu mismatch (bf16)"
    assert jnp.allclose(mean_value, val_ref, atol=2e-2, rtol=2e-2), "value mismatch (bf16)"

    # --- larger batch: multi-tile grid (>=2 tiles, triple-buffered x stream) -----
    big_keys = list(jax.random.split(jax.random.PRNGKey(1), 4))
    policy_big = make_policy(1000, big_keys)
    val_ref_b, mu_ref_b = reference(policy_big)
    mean_value_b, mu_b = neural_bandit_vae_forward(policy_big, packed_bf16, batch_tile=128)
    jax.block_until_ready((mean_value_b, mu_b))
    assert mu_b.shape == (1000, feat_dim) and mean_value_b.shape == (1000, 1)
    assert jnp.allclose(mu_b, mu_ref_b, atol=2e-2, rtol=2e-2), "mu mismatch (multi-tile)"
    assert jnp.allclose(mean_value_b, val_ref_b, atol=2e-2, rtol=2e-2), "value mismatch (multi-tile)"

    print("KERNEL_OK")
</pallas_src>

<mosaic_0001>
module attributes {stable_mosaic.version = 11 : i64} {
  func.func @_vae_forward_kernel(%arg0: i32, %arg1: memref<8x128xf32, #tpu.memory_space<vmem>>, %arg2: memref<128x32xf32, #tpu.memory_space<vmem>>, %arg3: memref<32x32xf32, #tpu.memory_space<vmem>>, %arg4: memref<1x32xf32, #tpu.memory_space<vmem>>, %arg5: memref<32x128xf32, #tpu.memory_space<vmem>>, %arg6: memref<1x128xf32, #tpu.memory_space<vmem>>, %arg7: memref<8x128xf32, #tpu.memory_space<vmem>>) attributes {dimension_semantics = [#tpu.dimension_semantics<parallel>], iteration_bounds = array<i64: 1>, scalar_prefetch = 0 : i64, scratch_operands = 0 : i64, tpu.core_type = #tpu.core_type<tc>, window_params = [{transform_indices = @transform_0, window_bounds = array<i64: 8, 128>}, {pipeline_mode = #tpu.pipeline_mode<synchronous>, transform_indices = @transform_1, window_bounds = array<i64: 128, 32>}, {pipeline_mode = #tpu.pipeline_mode<synchronous>, transform_indices = @transform_2, window_bounds = array<i64: 32, 32>}, {pipeline_mode = #tpu.pipeline_mode<synchronous>, transform_indices = @transform_3, window_bounds = array<i64: 1, 32>}, {pipeline_mode = #tpu.pipeline_mode<synchronous>, transform_indices = @transform_4, window_bounds = array<i64: 32, 128>}, {pipeline_mode = #tpu.pipeline_mode<synchronous>, transform_indices = @transform_5, window_bounds = array<i64: 1, 128>}, {transform_indices = @transform_6, window_bounds = array<i64: 8, 128>}]} {
    %c0 = arith.constant 0 : index
    %c0_0 = arith.constant 0 : index
    %0 = vector.load %arg1[%c0, %c0_0] : memref<8x128xf32, #tpu.memory_space<vmem>>, vector<8x128xf32>
    %c0_1 = arith.constant 0 : index
    %c0_2 = arith.constant 0 : index
    %1 = vector.load %arg2[%c0_1, %c0_2] : memref<128x32xf32, #tpu.memory_space<vmem>>, vector<128x32xf32>
    %cst = arith.constant dense<0.000000e+00> : vector<8x32xf32>
    %2 = tpu.matmul %0, %1, %cst {dimension_numbers = #tpu.dot_dimension_numbers<[1], [0], [0], [1], [0, 0, 1, 1], [], []>} : vector<8x128xf32>, vector<128x32xf32>, vector<8x32xf32> -> vector<8x32xf32>
    %3 = math.tanh %2 : vector<8x32xf32>
    %c0_3 = arith.constant 0 : index
    %c0_4 = arith.constant 0 : index
    %4 = vector.load %arg3[%c0_3, %c0_4] : memref<32x32xf32, #tpu.memory_space<vmem>>, vector<32x32xf32>
    %cst_5 = arith.constant dense<0.000000e+00> : vector<8x32xf32>
    %5 = tpu.matmul %3, %4, %cst_5 {dimension_numbers = #tpu.dot_dimension_numbers<[1], [0], [0], [1], [0, 0, 1, 1], [], []>} : vector<8x32xf32>, vector<32x32xf32>, vector<8x32xf32> -> vector<8x32xf32>
    %c0_6 = arith.constant 0 : index
    %c0_7 = arith.constant 0 : index
    %6 = vector.load %arg4[%c0_6, %c0_7] : memref<1x32xf32, #tpu.memory_space<vmem>>, vector<1x32xf32>
    %7 = vector.broadcast %6 : vector<1x32xf32> to vector<8x32xf32>
    %8 = arith.addf %5, %7 : vector<8x32xf32>
    %9 = math.tanh %8 : vector<8x32xf32>
    %c0_8 = arith.constant 0 : index
    %c0_9 = arith.constant 0 : index
    %10 = vector.load %arg5[%c0_8, %c0_9] : memref<32x128xf32, #tpu.memory_space<vmem>>, vector<32x128xf32>
    %cst_10 = arith.constant dense<0.000000e+00> : vector<8x128xf32>
    %11 = tpu.matmul %9, %10, %cst_10 {dimension_numbers = #tpu.dot_dimension_numbers<[1], [0], [0], [1], [0, 0, 1, 1], [], []>} : vector<8x32xf32>, vector<32x128xf32>, vector<8x128xf32> -> vector<8x128xf32>
    %c0_11 = arith.constant 0 : index
    %c0_12 = arith.constant 0 : index
    %12 = vector.load %arg6[%c0_11, %c0_12] : memref<1x128xf32, #tpu.memory_space<vmem>>, vector<1x128xf32>
    %13 = vector.broadcast %12 : vector<1x128xf32> to vector<8x128xf32>
    %14 = arith.addf %11, %13 : vector<8x128xf32>
    %c0_13 = arith.constant 0 : index
    %c0_14 = arith.constant 0 : index
    %15 = vector.load %arg7[%c0_13, %c0_14] : memref<8x128xf32, #tpu.memory_space<vmem>>, vector<8x128xf32>
    tpu.vector_store %arg7[%c0_13, %c0_14], %14 {strides = array<i32>} : memref<8x128xf32, #tpu.memory_space<vmem>>, vector<8x128xf32>,
    return
  }
  func.func @transform_0(%arg0: i32) -> (i32, i32) {
    %c0_i32 = arith.constant 0 : i32
    %c0_i32_0 = arith.constant 0 : i32
    return %arg0, %c0_i32 : i32, i32
  }
  func.func @transform_1(%arg0: i32) -> (i32, i32) {
    %c0_i32 = arith.constant 0 : i32
    %c0_i32_0 = arith.constant 0 : i32
    %c0_i32_1 = arith.constant 0 : i32
    return %c0_i32, %c0_i32_0 : i32, i32
  }
  func.func @transform_2(%arg0: i32) -> (i32, i32) {
    %c0_i32 = arith.constant 0 : i32
    %c0_i32_0 = arith.constant 0 : i32
    %c0_i32_1 = arith.constant 0 : i32
    return %c0_i32, %c0_i32_0 : i32, i32
  }
  func.func @transform_3(%arg0: i32) -> (i32, i32) {
    %c0_i32 = arith.constant 0 : i32
    %c0_i32_0 = arith.constant 0 : i32
    %c0_i32_1 = arith.constant 0 : i32
    return %c0_i32, %c0_i32_0 : i32, i32
  }
  func.func @transform_4(%arg0: i32) -> (i32, i32) {
    %c0_i32 = arith.constant 0 : i32
    %c0_i32_0 = arith.constant 0 : i32
    %c0_i32_1 = arith.constant 0 : i32
    return %c0_i32, %c0_i32_0 : i32, i32
  }
  func.func @transform_5(%arg0: i32) -> (i32, i32) {
    %c0_i32 = arith.constant 0 : i32
    %c0_i32_0 = arith.constant 0 : i32
    %c0_i32_1 = arith.constant 0 : i32
    return %c0_i32, %c0_i32_0 : i32, i32
  }
  func.func @transform_6(%arg0: i32) -> (i32, i32) {
    %c0_i32 = arith.constant 0 : i32
    %c0_i32_0 = arith.constant 0 : i32
    return %arg0, %c0_i32 : i32, i32
  }
}

</mosaic_0001>

<bundles_post_ra>
// kernel: tpu_custom_call.1
= control target key start
LH: loop header
LB: loop body
LE: loop exit
PB: predicated region body
PF: predicated region fallthrough
CT: control target
= control target key end

     0   :  { %v453_v3 = vmov 0.0|0.0   ;;  %vm454_vm0 = vmmov 0   ;;  %v455_v6 = vmov 0.0   ;;  %s602_s0 = inlined_call_operand.vmem [shape: f32[8,128], index: 0, kind: input, shape index: {}]   ;;  %s603_s1 = inlined_call_operand.vmem [shape: f32[128,32], index: 1, kind: input, shape index: {}]   ;;  %s604_s2 = inlined_call_operand.vmem [shape: f32[32,32], index: 2, kind: input, shape index: {}]   ;;  %s605_s3 = inlined_call_operand.vmem [shape: f32[1,32], index: 3, kind: input, shape index: {}]   ;;  %s606_s4 = inlined_call_operand.vmem [shape: f32[32,128], index: 4, kind: input, shape index: {}]   ;;  %s607_s5 = inlined_call_operand.vmem [shape: f32[1,128], index: 5, kind: input, shape index: {}]   ;;  %s608_s6 = inlined_call_operand.hbm [shape: f32[8,128], index: 6, kind: output, shape index: {}]  }
   0x1   :  { %v25_v0 = vld [vmem:[%s603_s1] sm:$0xff]  ;;  %v26_v1 = vld [vmem:[%s603_s1 + $0x8] sm:$0xff]  ;;  %v27_v2 = vld [vmem:[%s603_s1 + $0x10] sm:$0xff]  ;;  %385 = vmatprep.subr.bf16.mxu0 %v453_v3  ;;  %360 = vmatprep.mubr.msk.f32.mxu0 %vm454_vm0, %v455_v6 }
   0x2   :  { %v386_v4 = vpack.c.bf16 %v26_v1, %v25_v0  ;;  %v28_v5 = vld [vmem:[%s603_s1 + $0x18] sm:$0xff]  ;;  %409 = vmatprep.subr.bf16.mxu1 %v453_v3  ;;  %371 = vmatprep.mubr.msk.f32.mxu1 %vm454_vm0, %v455_v6  ;;  %v29_v8 = vld [vmem:[%s603_s1 + $0x20] sm:$0xff]  ;;  %v30_v9 = vld [vmem:[%s603_s1 + $0x28] sm:$0xff] }
   0x3   :  { %v389_v7 = vpack.c.bf16 %v28_v5, %v27_v2 }
   0x4   :  { %387 = vmatpush3.bf16.msra.mxu0 %v386_v4 }
   0x5   :  { %388 = vmatprep.subr.bf16.mxu0 %v453_v3 }
   0x6   :  { %11 = vsyncpa [#allocation3], 0  ;;  %v392_v10 = vpack.c.bf16 %v30_v9, %v29_v8  ;;  %v31_v11 = vld [vmem:[%s603_s1 + $0x30] sm:$0xff]  ;;  %v32_v12 = vld [vmem:[%s603_s1 + $0x38] sm:$0xff]  ;;  %vm123_vm1 = vcmask 261120  }
   0x7   :  { %v395_v13 = vpack.c.bf16 %v32_v12, %v31_v11  ;;  %v33_v14 = vld [vmem:[%s603_s1 + $0x40] sm:$0xff]  ;;  %v34_v15 = vld [vmem:[%s603_s1 + $0x48] sm:$0xff]  ;;  %v35_v17 = vld [vmem:[%s603_s1 + $0x50] sm:$0xff] }
   0x8   :  { %390 = vmatpush3.bf16.msra.mxu0 %v389_v7  ;;  %v398_v16 = vpack.c.bf16 %v34_v15, %v33_v14  ;;  %v36_v18 = vld [vmem:[%s603_s1 + $0x58] sm:$0xff]  ;;  %v37_v20 = vld [vmem:[%s603_s1 + $0x60] sm:$0xff]  ;;  %v38_v21 = vld [vmem:[%s603_s1 + $0x68] sm:$0xff] }
   0x9   :  { %391 = vmatprep.subr.bf16.mxu0 %v453_v3  ;;  %v401_v19 = vpack.c.bf16 %v36_v18, %v35_v17  ;;  %v404_v22 = vpack.c.bf16 %v38_v21, %v37_v20  ;;  %v39_v23 = vld [vmem:[%s603_s1 + $0x70] sm:$0xff]  ;;  %v40_v24 = vld [vmem:[%s603_s1 + $0x78] sm:$0xff]  ;;  %v24_v26 = vld [vmem:[%s602_s0] sm:$0xff] }
   0xa   :  { %v407_v25 = vpack.c.bf16 %v40_v24, %v39_v23  ;;  %v112_v27 = vld [vmem:[%s604_s2] sm:$0xff]  ;;  %v113_v28 = vld [vmem:[%s604_s2 + $0x8] sm:$0xff]  ;;  %v114_v29 = vld [vmem:[%s604_s2 + $0x10] sm:$0xff] }
   0xb   :  { %v410_v30 = vpack.c.bf16 %v113_v28, %v112_v27  ;;  %v115_v31 = vld [vmem:[%s604_s2 + $0x18] sm:$0xff]  ;;  %v198_v36 = vld [vmem:[%s606_s4] sm:$0xff]  ;;  %v199_v37 = vld [vmem:[%s606_s4 + $0x8] sm:$0xff] }
   0xc   :  { %393 = vmatpush3.bf16.msra.mxu0 %v392_v10  ;;  %v413_v32 = vpack.c.bf16 %v115_v31, %v114_v29  ;;  %v200_v38 = vld [vmem:[%s606_s4 + $0x10] sm:$0xff]  ;;  %v416_v39 = vpack.c.bf16 %v199_v37, %v198_v36  ;;  %v201_v40 = vld [vmem:[%s606_s4 + $0x18] sm:$0xff]  ;;  %v297_v42 = vld [vmem:[%s605_s3] ss:$0 sm:$0xff]  ;;  %s456_s4 = smov [#allocation2]  }
   0xd   :  { %394 = vmatprep.subr.bf16.mxu0 %v453_v3  ;;  %411 = vmatpush3.bf16.msra.mxu1 %v410_v30  ;;  %v419_v41 = vpack.c.bf16 %v201_v40, %v200_v38  ;;  %v299_v47 = vld [vmem:[%s607_s5] ss:$0 sm:$0xff]  ;;  %s289_s24 = sshll.u32 %s456_s4, 4  ;;  %s290_s24 = int_to_ptr.vmem [resolvable:$true] %s289_s24 }
   0xe   :  { %412 = vmatprep.subr.bf16.mxu1 %v453_v3  ;;  %s429_s25 = scalar_lea.vmem %s290_s24, 128  ;;  %p434_p1 = scmp.lt.s32.totalorder %s290_s24, %s290_s24 }
   0xf   :  { %p430_p0 = scmp.ne.s32.totalorder %s290_s24, %s429_s25  ;;  %p435_p2 = scmp.lt.s32.totalorder %s429_s25, %s429_s25 }
  0x10   :  { %396 = vmatpush3.bf16.msra.mxu0 %v395_v13 }
  0x11   :  { %397 = vmatprep.subr.bf16.mxu0 %v453_v3  ;;  %414 = vmatpush3.bf16.msra.mxu1 %v413_v32  ;;  %p436_p3 = por %p435_p2, %p434_p1 }
  0x12   :  { %415 = vmatprep.subr.bf16.mxu1 %v453_v3 }
  0x13   :  { %p437_p4 = pnand %p436_p3, %p430_p0 }
  0x14   :  { %399 = vmatpush3.bf16.msra.mxu0 %v398_v16 }
  0x15   :  { %400 = vmatprep.subr.bf16.mxu0 %v453_v3 }
  0x18   :  { %402 = vmatpush3.bf16.msra.mxu0 %v401_v19 }
  0x19   :  { %403 = vmatprep.subr.bf16.mxu0 %v453_v3 }
  0x1c   :  { %405 = vmatpush3.bf16.msra.mxu0 %v404_v22 }
  0x1d   :  { %406 = vmatprep.subr.bf16.mxu0 %v453_v3 }
  0x20   :  { %408 = vmatpush3.bf16.msra.mxu0 %v407_v25 }
  0x23   :  { %361 = vmatmul.mubr.f32.vlgmr.msra.gmra.mrb[0].mxu0 %v24_v26 }
  0xf6   :  { %v107_v33 = vpop.f32.mrb[0].mxu0 }
  0xf7   :  { %425 = vtanh.f32 %v107_v33  ;;  %v362_v34 = vpop.f32.mrb[1].mxu0 }
 0x101   :  { %v426_v35 = vpop.eup %425 }
 0x102   :  { %372 = vmatmul.mubr.msk.f32.vlgmr.msra.gmra.mrb[0].mxu1 %vm123_vm1, %v426_v35 }
 0x103   :  { %382 = vmatprep.mubr.msk.f32.mxu1 %vm454_vm0, %v455_v6  ;;  %417 = vmatpush3.bf16.msra.mxu1 %v416_v39 }
 0x104   :  { %418 = vmatprep.subr.bf16.mxu1 %v453_v3 }
 0x107   :  { %420 = vmatpush3.bf16.msra.mxu1 %v419_v41 }
 0x1d5   :  { %v193_v43 = vpop.f32.mrb[0].mxu1 }
 0x1d6   :  { %v194_v44 = vadd.f32 %v297_v42, %v193_v43  ;;  %v373_v45 = vpop.f32.mrb[1].mxu1 }
 0x1d8   :  { %427 = vtanh.f32 %v194_v44 }
 0x1e2   :  { %v428_v46 = vpop.eup %427 }
 0x1e3   :  { %383 = vmatmul.mubr.msk.f32.vlgmr.msra.gmra.mrb[2].mxu1 %vm123_vm1, %v428_v46 }
 0x2b6   :  { %v278_v48 = vpop.f32.mrb[2].mxu1 }
 0x2b7   :  { %v279_v49 = vadd.f32 %v299_v47, %v278_v48  ;;  %v384_v50 = vpop.f32.mrb[3].mxu1 }
 0x2b9   :  { %282 = vst [vmem:[#allocation2] sm:$0xff] %v279_v49 }
 0x2ba   :  { %440 = shalt.err (!%p437_p4)
}
 0x2bb   :  { %s441_s27 = scalar_lea.hbm %s608_s6, 128 }
 0x2bc   :  { %p442_p5 = scmp.ne.s32.totalorder %s608_s6, %s441_s27  ;;  %p445_p6 = scmp.lt.u32.totalorder %s441_s27, %s608_s6 }
 0x2be   :  { %p447_p7 = pnand %p445_p6, %p442_p5 }
 0x2c0   :  { %450 = shalt.err (!%p447_p7)
}
 0x2c1   :  { %292 = dma.vmem_to_hbm [thread:$0]  %s290_s24, 128, %s608_s6, [#allocation3]  }
 0x2c2   :  { %451 = dma.done.wait [#allocation3], 128  }
 0x2c3   :  { %452 = vsyncadd [#allocation3], 4294967168 }
 0x2c4   :  { %296 = vsyncpa [#allocation3], 1 }

</bundles_post_ra>
